<compile_context>
chip_gen: v6e
topology: v6e:2x2x1
jax: 0.10.0
libtpu: 0.0.40
codegen_flags: <defaults>
</compile_context>

<pallas_src>
import functools

import jax
import jax.numpy as jnp
from jax import lax
from jax.experimental import pallas as pl
from jax.experimental.pallas import tpu as pltpu


def _layer_kernel(x_ref,
                  wqkv_ref, bqkv_ref,
                  wo_ref,
                  w1_ref, b1_ref,
                  w2_ref,
                  vecs_ref,          # (6, E): rows = bo, n1w, n1b, b2, n2w, n2b
                  out_ref,
                  *, tb, seq, emb):
    eps = 1e-5
    rows = tb * seq

    x3 = x_ref[...].astype(jnp.float32)            # (TB, L, E)
    xr = x3.reshape(rows, emb)                     # (R, E) row slab (sublane-only collapse)

    vecs = vecs_ref[...].astype(jnp.float32)
    bo, n1w, n1b = vecs[0:1, :], vecs[1:2, :], vecs[2:3, :]
    b2, n2w, n2b = vecs[3:4, :], vecs[4:5, :], vecs[5:6, :]

    mm_dtype = wqkv_ref.dtype                      # f32 here; bf16 if packed for v6e/v7x

    # ---- fused QKV projection (1/sqrt(E) scale pre-folded into the Q columns/bias) ----
    qkv = jnp.dot(xr.astype(mm_dtype), wqkv_ref[...],
                  preferred_element_type=jnp.float32) + bqkv_ref[...].astype(jnp.float32)
    q = qkv[:, 0:emb].reshape(tb, seq, emb)
    k = qkv[:, emb:2 * emb].reshape(tb, seq, emb)
    v = qkv[:, 2 * emb:3 * emb].reshape(tb, seq, emb)

    # ---- single-head attention, batched over TB; contract last dims (no k.T) ----
    s = jnp.einsum('bqd,bkd->bqk', q, k, preferred_element_type=jnp.float32)   # (TB, L, L)
    s = s - jnp.max(s, axis=-1, keepdims=True)
    p = jnp.exp(s)
    p = p * pl.reciprocal(jnp.sum(p, axis=-1, keepdims=True), approx=True)      # EUP slot
    attn = jnp.einsum('bqk,bkd->bqd', p.astype(mm_dtype), v.astype(mm_dtype),
                      preferred_element_type=jnp.float32)                       # (TB, L, E)
    attn = jnp.dot(attn.reshape(rows, emb).astype(mm_dtype), wo_ref[...],
                   preferred_element_type=jnp.float32) + bo

    # ---- residual + LayerNorm 1 (f32 statistics, rsqrt on EUP) ----
    h = xr + attn
    mu = jnp.mean(h, axis=-1, keepdims=True)
    var = jnp.mean((h - mu) ** 2, axis=-1, keepdims=True)
    h = (h - mu) * lax.rsqrt(var + eps) * n1w + n1b

    # ---- feed forward: Linear(E->F) -> ReLU -> Linear(F->E) ----
    f = jnp.dot(h.astype(mm_dtype), w1_ref[...],
                preferred_element_type=jnp.float32) + b1_ref[...].astype(jnp.float32)
    f = jnp.maximum(f, 0.0)
    f = jnp.dot(f.astype(mm_dtype), w2_ref[...],
                preferred_element_type=jnp.float32) + b2

    # ---- residual + LayerNorm 2 ----
    y = h + f
    mu2 = jnp.mean(y, axis=-1, keepdims=True)
    var2 = jnp.mean((y - mu2) ** 2, axis=-1, keepdims=True)
    y = (y - mu2) * lax.rsqrt(var2 + eps) * n2w + n2b

    out_ref[...] = y.reshape(tb, seq, emb).astype(out_ref.dtype)


def graph_transformer_layer(x_lne, kp, *, block_batch=None):
    """x_lne: (L, N, E) — PyTorch's default MultiheadAttention layout. kp: packed params."""
    L, N, E = x_lne.shape
    x = jnp.transpose(x_lne, (1, 0, 2))            # (N, L, E)

    if block_batch is None:
        # Aim for ~128 rows per block, but keep >=2 grid steps when possible so both
        # v7x TensorCores get work (no-op on single-TC v5e/v6e).
        target = max(1, 128 // max(L, 1))
        block_batch = max(1, min(target, N // 2 if N >= 2 else N))
        while N % block_batch:
            block_batch -= 1
    tb = block_batch
    assert N % tb == 0
    grid = (N // tb,)

    weights = (kp['wqkv'], kp['bqkv'], kp['wo'], kp['w1'], kp['b1'], kp['w2'], kp['vecs'])

    def inv_spec(p):                               # grid-invariant (fetched once, stays resident)
        nd = p.ndim
        return pl.BlockSpec(p.shape, lambda n, _nd=nd: (0,) * _nd)

    kernel = functools.partial(_layer_kernel, tb=tb, seq=L, emb=E)

    out = pl.pallas_call(
        kernel,
        out_shape=jax.ShapeDtypeStruct((N, L, E), x.dtype),
        grid=grid,
        in_specs=[pl.BlockSpec((tb, L, E), lambda n: (n, 0, 0))]
                 + [inv_spec(w) for w in weights],
        out_specs=pl.BlockSpec((tb, L, E), lambda n: (n, 0, 0)),
        compiler_params=pltpu.CompilerParams(dimension_semantics=("parallel",)),
    )(x, *weights)
    return jnp.transpose(out, (1, 0, 2))           # back to (L, N, E)


def init_params(key, in_features, hidden_features):
    """Raw PyTorch-equivalent parameters (weights pre-transposed to x @ W form)."""
    E, F = in_features, hidden_features
    ks = jax.random.split(key, 12)
    s = 0.1
    f32 = jnp.float32
    return dict(
        wq=jax.random.normal(ks[0], (E, E), f32) * s,
        wk=jax.random.normal(ks[1], (E, E), f32) * s,
        wv=jax.random.normal(ks[2], (E, E), f32) * s,
        bq=jax.random.normal(ks[3], (1, E), f32) * s,
        bk=jax.random.normal(ks[4], (1, E), f32) * s,
        bv=jax.random.normal(ks[5], (1, E), f32) * s,
        wo=jax.random.normal(ks[6], (E, E), f32) * s,
        bo=jax.random.normal(ks[7], (1, E), f32) * s,
        n1w=jnp.ones((1, E), f32), n1b=jnp.zeros((1, E), f32),
        w1=jax.random.normal(ks[8], (E, F), f32) * s,
        b1=jax.random.normal(ks[9], (1, F), f32) * s,
        w2=jax.random.normal(ks[10], (F, E), f32) * s,
        b2=jax.random.normal(ks[11], (1, E), f32) * s,
        n2w=jnp.ones((1, E), f32), n2b=jnp.zeros((1, E), f32),
    )


def pack_params(p, *, matmul_dtype=jnp.float32):
    """One-time packing (parameter-init/constant time, NOT per call):
    - fuse Q/K/V into (E, 3E) / (1, 3E), pre-fold the 1/sqrt(E) query scale,
    - concatenate the six (1, E) vectors into one (6, E) slab,
    - optionally cast matmul weights to bf16 for v6e/v7x (f32 accumulation kept in-kernel)."""
    E = p['wq'].shape[0]
    scale = 1.0 / jnp.sqrt(jnp.float32(E))
    wqkv = jnp.concatenate([p['wq'] * scale, p['wk'], p['wv']], axis=1)   # (E, 3E)
    bqkv = jnp.concatenate([p['bq'] * scale, p['bk'], p['bv']], axis=1)   # (1, 3E)
    vecs = jnp.concatenate([p['bo'], p['n1w'], p['n1b'],
                            p['b2'], p['n2w'], p['n2b']], axis=0)         # (6, E)
    return dict(
        wqkv=wqkv.astype(matmul_dtype),
        bqkv=bqkv.astype(jnp.float32),
        wo=p['wo'].astype(matmul_dtype),
        w1=p['w1'].astype(matmul_dtype),
        b1=p['b1'].astype(jnp.float32),
        w2=p['w2'].astype(matmul_dtype),
        vecs=vecs.astype(jnp.float32),
    )


def reference(x_lne, p):
    """Pure-JAX reference mirroring the PyTorch forward pass (uses raw params)."""
    x = jnp.transpose(x_lne, (1, 0, 2)).astype(jnp.float32)   # (N, L, E)
    E = x.shape[-1]
    eps = 1e-5
    q = (x @ p["wq"] + p["bq"]) / jnp.sqrt(jnp.float32(E))
    k = x @ p["wk"] + p["bk"]
    v = x @ p["wv"] + p["bv"]
    a = jax.nn.softmax(jnp.einsum("nqe,nke->nqk", q, k), axis=-1)
    attn = jnp.einsum("nqk,nke->nqe", a, v) @ p["wo"] + p["bo"]

    h = x + attn
    mu = jnp.mean(h, axis=-1, keepdims=True)
    var = jnp.mean((h - mu) ** 2, axis=-1, keepdims=True)
    h = (h - mu) / jnp.sqrt(var + eps) * p["n1w"] + p["n1b"]

    f = jnp.maximum(h @ p["w1"] + p["b1"], 0.0) @ p["w2"] + p["b2"]
    y = h + f
    mu2 = jnp.mean(y, axis=-1, keepdims=True)
    var2 = jnp.mean((y - mu2) ** 2, axis=-1, keepdims=True)
    y = (y - mu2) / jnp.sqrt(var2 + eps) * p["n2w"] + p["n2b"]
    return jnp.transpose(y, (1, 0, 2))


if __name__ == "__main__":
    # seq, batch, in_features, ff hidden. batch=4 so TB=2 blocks x 2 parallel grid steps.
    L, N, E, F = 8, 4, 32, 64
    key = jax.random.PRNGKey(0)
    kx, kp = jax.random.split(key)
    x = jax.random.normal(kx, (L, N, E), jnp.float32)      # PyTorch MHA layout (L, N, E)
    params = init_params(kp, E, F)
    kparams = pack_params(params)                          # one-time fuse/scale/pack (f32 demo)

    out = graph_transformer_layer(x, kparams)
    out = jax.block_until_ready(out)

    ref = reference(x, params)
    err = float(jnp.max(jnp.abs(out - ref)))
    assert out.shape == (L, N, E)
    # tolerance allows the approximate EUP reciprocal used for the softmax denominator
    assert err < 1e-3, f"max abs error {err}"
    print("KERNEL_OK")
</pallas_src>

<mosaic_0001>
module attributes {stable_mosaic.version = 11 : i64} {
  func.func @_layer_kernel(%arg0: i32, %arg1: memref<2x8x32xf32, #tpu.memory_space<vmem>>, %arg2: memref<32x96xf32, #tpu.memory_space<vmem>>, %arg3: memref<1x96xf32, #tpu.memory_space<vmem>>, %arg4: memref<32x32xf32, #tpu.memory_space<vmem>>, %arg5: memref<32x64xf32, #tpu.memory_space<vmem>>, %arg6: memref<1x64xf32, #tpu.memory_space<vmem>>, %arg7: memref<64x32xf32, #tpu.memory_space<vmem>>, %arg8: memref<6x32xf32, #tpu.memory_space<vmem>>, %arg9: memref<2x8x32xf32, #tpu.memory_space<vmem>>) attributes {dimension_semantics = [#tpu.dimension_semantics<parallel>], iteration_bounds = array<i64: 2>, scalar_prefetch = 0 : i64, scratch_operands = 0 : i64, tpu.core_type = #tpu.core_type<tc>, window_params = [{transform_indices = @transform_0, window_bounds = array<i64: 2, 8, 32>}, {pipeline_mode = #tpu.pipeline_mode<synchronous>, transform_indices = @transform_1, window_bounds = array<i64: 32, 96>}, {pipeline_mode = #tpu.pipeline_mode<synchronous>, transform_indices = @transform_2, window_bounds = array<i64: 1, 96>}, {pipeline_mode = #tpu.pipeline_mode<synchronous>, transform_indices = @transform_3, window_bounds = array<i64: 32, 32>}, {pipeline_mode = #tpu.pipeline_mode<synchronous>, transform_indices = @transform_4, window_bounds = array<i64: 32, 64>}, {pipeline_mode = #tpu.pipeline_mode<synchronous>, transform_indices = @transform_5, window_bounds = array<i64: 1, 64>}, {pipeline_mode = #tpu.pipeline_mode<synchronous>, transform_indices = @transform_6, window_bounds = array<i64: 64, 32>}, {pipeline_mode = #tpu.pipeline_mode<synchronous>, transform_indices = @transform_7, window_bounds = array<i64: 6, 32>}, {transform_indices = @transform_8, window_bounds = array<i64: 2, 8, 32>}]} {
    %c0 = arith.constant 0 : index
    %c0_0 = arith.constant 0 : index
    %c0_1 = arith.constant 0 : index
    %0 = vector.load %arg1[%c0, %c0_0, %c0_1] : memref<2x8x32xf32, #tpu.memory_space<vmem>>, vector<2x8x32xf32>
    %1 = vector.shape_cast %0 : vector<2x8x32xf32> to vector<16x32xf32>
    %c0_2 = arith.constant 0 : index
    %c0_3 = arith.constant 0 : index
    %2 = vector.load %arg8[%c0_2, %c0_3] : memref<6x32xf32, #tpu.memory_space<vmem>>, vector<6x32xf32>
    %3 = vector.extract_strided_slice %2 {offsets = [0, 0], sizes = [1, 32], strides = [1, 1]} : vector<6x32xf32> to vector<1x32xf32>
    %4 = vector.extract_strided_slice %2 {offsets = [1, 0], sizes = [1, 32], strides = [1, 1]} : vector<6x32xf32> to vector<1x32xf32>
    %5 = vector.extract_strided_slice %2 {offsets = [2, 0], sizes = [1, 32], strides = [1, 1]} : vector<6x32xf32> to vector<1x32xf32>
    %6 = vector.extract_strided_slice %2 {offsets = [3, 0], sizes = [1, 32], strides = [1, 1]} : vector<6x32xf32> to vector<1x32xf32>
    %7 = vector.extract_strided_slice %2 {offsets = [4, 0], sizes = [1, 32], strides = [1, 1]} : vector<6x32xf32> to vector<1x32xf32>
    %8 = vector.extract_strided_slice %2 {offsets = [5, 0], sizes = [1, 32], strides = [1, 1]} : vector<6x32xf32> to vector<1x32xf32>
    %c0_4 = arith.constant 0 : index
    %c0_5 = arith.constant 0 : index
    %9 = vector.load %arg2[%c0_4, %c0_5] : memref<32x96xf32, #tpu.memory_space<vmem>>, vector<32x96xf32>
    %cst = arith.constant dense<0.000000e+00> : vector<16x96xf32>
    %10 = tpu.matmul %1, %9, %cst {dimension_numbers = #tpu.dot_dimension_numbers<[1], [0], [0], [1], [0, 0, 1, 1], [], []>} : vector<16x32xf32>, vector<32x96xf32>, vector<16x96xf32> -> vector<16x96xf32>
    %c0_6 = arith.constant 0 : index
    %c0_7 = arith.constant 0 : index
    %11 = vector.load %arg3[%c0_6, %c0_7] : memref<1x96xf32, #tpu.memory_space<vmem>>, vector<1x96xf32>
    %12 = vector.broadcast %11 : vector<1x96xf32> to vector<16x96xf32>
    %13 = arith.addf %10, %12 : vector<16x96xf32>
    %14 = vector.extract_strided_slice %13 {offsets = [0, 0], sizes = [16, 32], strides = [1, 1]} : vector<16x96xf32> to vector<16x32xf32>
    %15 = vector.shape_cast %14 : vector<16x32xf32> to vector<2x8x32xf32>
    %16 = vector.extract_strided_slice %13 {offsets = [0, 32], sizes = [16, 32], strides = [1, 1]} : vector<16x96xf32> to vector<16x32xf32>
    %17 = vector.shape_cast %16 : vector<16x32xf32> to vector<2x8x32xf32>
    %18 = vector.extract_strided_slice %13 {offsets = [0, 64], sizes = [16, 32], strides = [1, 1]} : vector<16x96xf32> to vector<16x32xf32>
    %19 = vector.shape_cast %18 : vector<16x32xf32> to vector<2x8x32xf32>
    "tpu.trace_start"() <{level = 10 : i32, message = "bqd,bkd->bqk"}> : () -> ()
    %cst_8 = arith.constant dense<0.000000e+00> : vector<2x8x8xf32>
    %20 = tpu.matmul %15, %17, %cst_8 {dimension_numbers = #tpu.dot_dimension_numbers<[2], [2], [1], [1], [0, 0, 0, 1, 1, 1], [0], [0]>} : vector<2x8x32xf32>, vector<2x8x32xf32>, vector<2x8x8xf32> -> vector<2x8x8xf32>
    "tpu.trace_stop"() : () -> ()
    %cst_9 = arith.constant dense<0xFF800000> : vector<2x8xf32>
    %21 = vector.multi_reduction <maximumf>, %20, %cst_9 [2] : vector<2x8x8xf32> to vector<2x8xf32>
    %22 = vector.shape_cast %21 : vector<2x8xf32> to vector<2x8x1xf32>
    %23 = vector.broadcast %22 : vector<2x8x1xf32> to vector<2x8x8xf32>
    %24 = arith.subf %20, %23 : vector<2x8x8xf32>
    %25 = math.exp %24 : vector<2x8x8xf32>
    %cst_10 = arith.constant dense<0.000000e+00> : vector<2x8xf32>
    %26 = vector.multi_reduction <add>, %25, %cst_10 [2] : vector<2x8x8xf32> to vector<2x8xf32>
    %27 = vector.shape_cast %26 : vector<2x8xf32> to vector<2x8x1xf32>
    %28 = tpu.reciprocal %27 {approx = true} : vector<2x8x1xf32> -> vector<2x8x1xf32>
    %29 = vector.broadcast %28 : vector<2x8x1xf32> to vector<2x8x8xf32>
    %30 = arith.mulf %25, %29 : vector<2x8x8xf32>
    "tpu.trace_start"() <{level = 10 : i32, message = "bqk,bkd->bqd"}> : () -> ()
    %cst_11 = arith.constant dense<0.000000e+00> : vector<2x8x32xf32>
    %31 = tpu.matmul %30, %19, %cst_11 {dimension_numbers = #tpu.dot_dimension_numbers<[2], [1], [1], [2], [0, 0, 0, 1, 1, 2], [0], [0]>} : vector<2x8x8xf32>, vector<2x8x32xf32>, vector<2x8x32xf32> -> vector<2x8x32xf32>
    "tpu.trace_stop"() : () -> ()
    %32 = vector.shape_cast %31 : vector<2x8x32xf32> to vector<16x32xf32>
    %c0_12 = arith.constant 0 : index
    %c0_13 = arith.constant 0 : index
    %33 = vector.load %arg4[%c0_12, %c0_13] : memref<32x32xf32, #tpu.memory_space<vmem>>, vector<32x32xf32>
    %cst_14 = arith.constant dense<0.000000e+00> : vector<16x32xf32>
    %34 = tpu.matmul %32, %33, %cst_14 {dimension_numbers = #tpu.dot_dimension_numbers<[1], [0], [0], [1], [0, 0, 1, 1], [], []>} : vector<16x32xf32>, vector<32x32xf32>, vector<16x32xf32> -> vector<16x32xf32>
    %35 = vector.broadcast %3 : vector<1x32xf32> to vector<16x32xf32>
    %36 = arith.addf %34, %35 : vector<16x32xf32>
    %37 = arith.addf %1, %36 : vector<16x32xf32>
    %cst_15 = arith.constant dense<0.000000e+00> : vector<16xf32>
    %38 = vector.multi_reduction <add>, %37, %cst_15 [1] : vector<16x32xf32> to vector<16xf32>
    %39 = vector.shape_cast %38 : vector<16xf32> to vector<16x1xf32>
    %cst_16 = arith.constant 3.200000e+01 : f32
    %40 = vector.broadcast %cst_16 : f32 to vector<16x1xf32>
    %41 = arith.divf %39, %40 : vector<16x1xf32>
    %42 = vector.broadcast %41 : vector<16x1xf32> to vector<16x32xf32>
    %43 = arith.subf %37, %42 : vector<16x32xf32>
    %44 = arith.mulf %43, %43 : vector<16x32xf32>
    %cst_17 = arith.constant dense<0.000000e+00> : vector<16xf32>
    %45 = vector.multi_reduction <add>, %44, %cst_17 [1] : vector<16x32xf32> to vector<16xf32>
    %46 = vector.shape_cast %45 : vector<16xf32> to vector<16x1xf32>
    %cst_18 = arith.constant 3.200000e+01 : f32
    %47 = vector.broadcast %cst_18 : f32 to vector<16x1xf32>
    %48 = arith.divf %46, %47 : vector<16x1xf32>
    %49 = vector.broadcast %41 : vector<16x1xf32> to vector<16x32xf32>
    %50 = arith.subf %37, %49 : vector<16x32xf32>
    %cst_19 = arith.constant 9.99999974E-6 : f32
    %51 = vector.broadcast %cst_19 : f32 to vector<16x1xf32>
    %52 = arith.addf %48, %51 : vector<16x1xf32>
    %53 = math.rsqrt %52 : vector<16x1xf32>
    %54 = vector.broadcast %53 : vector<16x1xf32> to vector<16x32xf32>
    %55 = arith.mulf %50, %54 : vector<16x32xf32>
    %56 = vector.broadcast %4 : vector<1x32xf32> to vector<16x32xf32>
    %57 = arith.mulf %55, %56 : vector<16x32xf32>
    %58 = vector.broadcast %5 : vector<1x32xf32> to vector<16x32xf32>
    %59 = arith.addf %57, %58 : vector<16x32xf32>
    %c0_20 = arith.constant 0 : index
    %c0_21 = arith.constant 0 : index
    %60 = vector.load %arg5[%c0_20, %c0_21] : memref<32x64xf32, #tpu.memory_space<vmem>>, vector<32x64xf32>
    %cst_22 = arith.constant dense<0.000000e+00> : vector<16x64xf32>
    %61 = tpu.matmul %59, %60, %cst_22 {dimension_numbers = #tpu.dot_dimension_numbers<[1], [0], [0], [1], [0, 0, 1, 1], [], []>} : vector<16x32xf32>, vector<32x64xf32>, vector<16x64xf32> -> vector<16x64xf32>
    %c0_23 = arith.constant 0 : index
    %c0_24 = arith.constant 0 : index
    %62 = vector.load %arg6[%c0_23, %c0_24] : memref<1x64xf32, #tpu.memory_space<vmem>>, vector<1x64xf32>
    %63 = vector.broadcast %62 : vector<1x64xf32> to vector<16x64xf32>
    %64 = arith.addf %61, %63 : vector<16x64xf32>
    %cst_25 = arith.constant 0.000000e+00 : f32
    %65 = vector.broadcast %cst_25 : f32 to vector<16x64xf32>
    %66 = arith.maximumf %64, %65 : vector<16x64xf32>
    %c0_26 = arith.constant 0 : index
    %c0_27 = arith.constant 0 : index
    %67 = vector.load %arg7[%c0_26, %c0_27] : memref<64x32xf32, #tpu.memory_space<vmem>>, vector<64x32xf32>
    %cst_28 = arith.constant dense<0.000000e+00> : vector<16x32xf32>
    %68 = tpu.matmul %66, %67, %cst_28 {dimension_numbers = #tpu.dot_dimension_numbers<[1], [0], [0], [1], [0, 0, 1, 1], [], []>} : vector<16x64xf32>, vector<64x32xf32>, vector<16x32xf32> -> vector<16x32xf32>
    %69 = vector.broadcast %6 : vector<1x32xf32> to vector<16x32xf32>
    %70 = arith.addf %68, %69 : vector<16x32xf32>
    %71 = arith.addf %59, %70 : vector<16x32xf32>
    %cst_29 = arith.constant dense<0.000000e+00> : vector<16xf32>
    %72 = vector.multi_reduction <add>, %71, %cst_29 [1] : vector<16x32xf32> to vector<16xf32>
    %73 = vector.shape_cast %72 : vector<16xf32> to vector<16x1xf32>
    %cst_30 = arith.constant 3.200000e+01 : f32
    %74 = vector.broadcast %cst_30 : f32 to vector<16x1xf32>
    %75 = arith.divf %73, %74 : vector<16x1xf32>
    %76 = vector.broadcast %75 : vector<16x1xf32> to vector<16x32xf32>
    %77 = arith.subf %71, %76 : vector<16x32xf32>
    %78 = arith.mulf %77, %77 : vector<16x32xf32>
    %cst_31 = arith.constant dense<0.000000e+00> : vector<16xf32>
    %79 = vector.multi_reduction <add>, %78, %cst_31 [1] : vector<16x32xf32> to vector<16xf32>
    %80 = vector.shape_cast %79 : vector<16xf32> to vector<16x1xf32>
    %cst_32 = arith.constant 3.200000e+01 : f32
    %81 = vector.broadcast %cst_32 : f32 to vector<16x1xf32>
    %82 = arith.divf %80, %81 : vector<16x1xf32>
    %83 = vector.broadcast %75 : vector<16x1xf32> to vector<16x32xf32>
    %84 = arith.subf %71, %83 : vector<16x32xf32>
    %cst_33 = arith.constant 9.99999974E-6 : f32
    %85 = vector.broadcast %cst_33 : f32 to vector<16x1xf32>
    %86 = arith.addf %82, %85 : vector<16x1xf32>
    %87 = math.rsqrt %86 : vector<16x1xf32>
    %88 = vector.broadcast %87 : vector<16x1xf32> to vector<16x32xf32>
    %89 = arith.mulf %84, %88 : vector<16x32xf32>
    %90 = vector.broadcast %7 : vector<1x32xf32> to vector<16x32xf32>
    %91 = arith.mulf %89, %90 : vector<16x32xf32>
    %92 = vector.broadcast %8 : vector<1x32xf32> to vector<16x32xf32>
    %93 = arith.addf %91, %92 : vector<16x32xf32>
    %94 = vector.shape_cast %93 : vector<16x32xf32> to vector<2x8x32xf32>
    %c0_34 = arith.constant 0 : index
    %c0_35 = arith.constant 0 : index
    %c0_36 = arith.constant 0 : index
    %95 = vector.load %arg9[%c0_34, %c0_35, %c0_36] : memref<2x8x32xf32, #tpu.memory_space<vmem>>, vector<2x8x32xf32>
    tpu.vector_store %arg9[%c0_34, %c0_35, %c0_36], %94 {strides = array<i32>} : memref<2x8x32xf32, #tpu.memory_space<vmem>>, vector<2x8x32xf32>,
    return
  }
  func.func @transform_0(%arg0: i32) -> (i32, i32, i32) {
    %c0_i32 = arith.constant 0 : i32
    %c0_i32_0 = arith.constant 0 : i32
    %c0_i32_1 = arith.constant 0 : i32
    return %arg0, %c0_i32, %c0_i32_0 : i32, i32, i32
  }
  func.func @transform_1(%arg0: i32) -> (i32, i32) {
    %c0_i32 = arith.constant 0 : i32
    %c0_i32_0 = arith.constant 0 : i32
    %c0_i32_1 = arith.constant 0 : i32
    return %c0_i32, %c0_i32_0 : i32, i32
  }
  func.func @transform_2(%arg0: i32) -> (i32, i32) {
    %c0_i32 = arith.constant 0 : i32
    %c0_i32_0 = arith.constant 0 : i32
    %c0_i32_1 = arith.constant 0 : i32
    return %c0_i32, %c0_i32_0 : i32, i32
  }
  func.func @transform_3(%arg0: i32) -> (i32, i32) {
    %c0_i32 = arith.constant 0 : i32
    %c0_i32_0 = arith.constant 0 : i32
    %c0_i32_1 = arith.constant 0 : i32
    return %c0_i32, %c0_i32_0 : i32, i32
  }
  func.func @transform_4(%arg0: i32) -> (i32, i32) {
    %c0_i32 = arith.constant 0 : i32
    %c0_i32_0 = arith.constant 0 : i32
    %c0_i32_1 = arith.constant 0 : i32
    return %c0_i32, %c0_i32_0 : i32, i32
  }
  func.func @transform_5(%arg0: i32) -> (i32, i32) {
    %c0_i32 = arith.constant 0 : i32
    %c0_i32_0 = arith.constant 0 : i32
    %c0_i32_1 = arith.constant 0 : i32
    return %c0_i32, %c0_i32_0 : i32, i32
  }
  func.func @transform_6(%arg0: i32) -> (i32, i32) {
    %c0_i32 = arith.constant 0 : i32
    %c0_i32_0 = arith.constant 0 : i32
    %c0_i32_1 = arith.constant 0 : i32
    return %c0_i32, %c0_i32_0 : i32, i32
  }
  func.func @transform_7(%arg0: i32) -> (i32, i32) {
    %c0_i32 = arith.constant 0 : i32
    %c0_i32_0 = arith.constant 0 : i32
    %c0_i32_1 = arith.constant 0 : i32
    return %c0_i32, %c0_i32_0 : i32, i32
  }
  func.func @transform_8(%arg0: i32) -> (i32, i32, i32) {
    %c0_i32 = arith.constant 0 : i32
    %c0_i32_0 = arith.constant 0 : i32
    %c0_i32_1 = arith.constant 0 : i32
    return %arg0, %c0_i32, %c0_i32_0 : i32, i32, i32
  }
}

</mosaic_0001>

<bundles_post_ra>
// kernel: tpu_custom_call.1
= control target key start
LH: loop header
LB: loop body
LE: loop exit
PB: predicated region body
PF: predicated region fallthrough
CT: control target
= control target key end

     0   :  { %13 = vsyncpa [#allocation3], 0  ;;  %s1871_s0 = inlined_call_operand.vmem [shape: f32[4,8,32], index: 0, kind: input, shape index: {}]   ;;  %s1872_s1 = inlined_call_operand.vmem [shape: f32[32,96], index: 1, kind: input, shape index: {}]   ;;  %s1873_s2 = inlined_call_operand.vmem [shape: f32[1,96], index: 2, kind: input, shape index: {}]   ;;  %s1874_s3 = inlined_call_operand.vmem [shape: f32[32,32], index: 3, kind: input, shape index: {}]   ;;  %s1875_s4 = inlined_call_operand.hbm [shape: f32[32,64], index: 4, kind: input, shape index: {}]   ;;  %s1876_s5 = inlined_call_operand.hbm [shape: f32[1,64], index: 5, kind: input, shape index: {}]   ;;  %s1877_s6 = inlined_call_operand.vmem [shape: f32[64,32], index: 6, kind: input, shape index: {}]   ;;  %s1878_s7 = inlined_call_operand.vmem [shape: f32[6,32], index: 7, kind: input, shape index: {}]   ;;  %s1879_s8 = inlined_call_operand.hbm [shape: f32[4,8,32], index: 8, kind: output, shape index: {}]  }
   0x1   :  { %14 = vsyncpa [#allocation6], 0 }
   0x2   :  { %15 = vsyncpa [#allocation4], 0 }
   0x3   :  { %17 = vsyncpa [#allocation4 + $0x1], 0  ;;  %s1621_s27 = smov 0   ;;  %s1623_s28 = smov 0  }
   0x4   :  { %s1625_s29 = smov 0   ;;  %s1627_s30 = smov 0  }
   0x5 LB: > { %s1642_s9 = sadd.s32 4294967295, %s1563_s30   ;;  %s1218_s10 = sadd.s32 4294967294, %s1563_s30   ;;  %s1563_s30 = sphi %s1627_s30, %s1892_s30   ;;  %s1559_s29 = sphi %s1625_s29, %s1891_s29   ;;  %s1555_s28 = sphi %s1623_s28, %s1890_s28   ;;  %s1551_s27 = sphi %s1621_s27, %s1889_s27  }
   0x6   : > { %s1646_s11 = sadd.s32 1, %s1563_s30   ;;  %s203_s12 = sadd.s32 1, %s1559_s29 }
   0x7   : > { %s200_s13 = ssub.s32 %s1563_s30, %s1646_s11  ;;  %p213_p0 = scmp.ne.s32.totalorder %s1559_s29, %s1555_s28 }
   0x8   : > { %p201_p1 = scmp.eq.s32.totalorder %s200_s13, 0  ;;  %p214_p2 = scmp.eq.s32.totalorder %s1642_s9, 1 }
   0x9   : > { %p219_p3 = scmp.ne.s32.totalorder %s1555_s28, %s1551_s27  ;;  %p220_p4 = scmp.eq.s32.totalorder %s1218_s10, 1 }
   0xa   : > { %s1657_s14 = scalar_select %p201_p1, %s1559_s29, %s203_s12  }
   0xb   : > { %p1659_p5 = por %p214_p2, %p213_p0  ;;  %p1663_p6 = por %p220_p4, %p219_p3 }
   0xc   : > { %p1219_p7 = scmp.ge.s32.totalorder %s1563_s30, 1  ;;  %p227_p8 = scmp.lt.s32.totalorder %s1563_s30, 3 }
   0xd   : > { %p1880_p9 = scmp.eq.s32.totalorder %s1642_s9, 0  ;;  %s1565_s18 = smov [#allocation2]  }
   0xe   : > { %p1670_p10 = pnand %p1219_p7, %p227_p8  ;;  %s248_s19 = sshll.u32 %s1565_s18, 4  ;;  %s249_s19 = int_to_ptr.vmem [resolvable:$true] %s248_s19 }
   0xf   : > { %s1566_s21 = smov [#allocation5]   ;;  %s1454_s23 = scalar_lea.vmem %s249_s19, 512 }
  0x10   : > { %p1369_p11 = pneg %p1670_p10  ;;  %s262_s22 = sshll.u32 %s1566_s21, 4  ;;  %s263_s22 = int_to_ptr.vmem [resolvable:$true] %s262_s22 }
  0x11   : > { %p1455_p0 = scmp.ne.s32.totalorder %s249_s19, %s1454_s23  ;;  %p1462_p3 = scmp.lt.s32.totalorder %s249_s19, %s249_s19 }
  0x12   : > { %p1678_p12 = pnand %p1880_p9, %p1369_p11  ;;  %p1463_p4 = scmp.lt.s32.totalorder %s1454_s23, %s1454_s23 }
  0x14   : > { %p1445_p13 = pneg %p1678_p12  ;;  %p1464_p7 = por %p1463_p4, %p1462_p3 }
  0x16   : > { %p1457_p1 = pnand %p1455_p0, %p1445_p13 }
  0x18   : > { %p1458_p2 = pneg %p1457_p1 }
  0x1a   : > { %p1465_p8 = pnand %p1464_p7, %p1458_p2 }
  0x1c   : > { %1468 = shalt.err (!%p1465_p8)
}
  0x1d   : > { %s1567_s24 = smov 128   ;;  %s1568_s25 = smov 8  }
  0x1e   : > { %1372 = dma.hbm_to_vmem [thread:$0]  (!%p1678_p12), %s1875_s4, 512, %s249_s19, [#allocation3], %s1567_s24, %s1567_s24, %s1568_s25  }
  0x1f   : > { %s1480_s12 = scalar_lea.vmem %s263_s22, 16  ;;  %s1487_s13 = scalar_lea.vmem %s263_s22, 32 }
  0x20   : > { %p1481_p11 = scmp.ne.s32.totalorder %s263_s22, %s1480_s12  ;;  %p1488_p9 = scmp.lt.s32.totalorder %s263_s22, %s263_s22 }
  0x21   : > { %p1489_p3 = scmp.lt.s32.totalorder %s1487_s13, %s1480_s12 }
  0x22   : > { %p1483_p0 = pnand %p1481_p11, %p1445_p13 }
  0x23   : > { %p1490_p2 = por %p1489_p3, %p1488_p9 }
  0x24   : > { %p1484_p1 = pneg %p1483_p0 }
  0x26   : > { %p1491_p4 = pnand %p1490_p2, %p1484_p1 }
  0x28   : > { %1494 = shalt.err (!%p1491_p4)
}
  0x29   : > { %1375 = dma.hbm_to_vmem [thread:$0]  (!%p1678_p12), %s1876_s5, 16, %s263_s22, [#allocation6]  }
  0x2a   : > { %290 = sbr.rel (%p1670_p10) target bundleno = 2313 (0x909), region = 52  ;;  %p1885_p7 = scmp.eq.s32.totalorder (!%p1670_p10), %s1642_s9, 0 }
  0x2f   : > { %1538 = dma.done.wait (%p1885_p7), [#allocation3], 512   ;;  %p1886_p13 = pmov %p1885_p7 }
  0x30   : > { %p1887_p8 = pmov %p1885_p7 }
  0x31   : > { %1540 = vsyncadd (%p1886_p13), [#allocation3], 4294966784 }
  0x32   : > { %1542 = dma.done.wait (%p1887_p8), [#allocation6], 16   ;;  %p1888_p9 = pmov %p1885_p7 }
  0x33   : > { %s1227_s19 = sshll.u32 %s1642_s9, 1  ;;  %vm349_vm0 = vcmask 261120   ;;  %v341_v0 = vld [vmem:[%s1872_s1 + $0x18] sm:$0xff]  ;;  %v340_v1 = vld [vmem:[%s1872_s1 + $0x10] sm:$0xff]  ;;  %v339_v3 = vld [vmem:[%s1872_s1 + $0x8] sm:$0xff]  ;;  %v1569_v6 = vmov 0.0   ;;  %v764_v46 = vlaneseq }
  0x34   : > { %1544 = vsyncadd (%p1888_p9), [#allocation6], 4294967280  ;;  %p329_p11 = scmp.lt.s32.totalorder %s1227_s19, 3  ;;  %1287 = vmatprep.subr.mxu1 %v341_v0  ;;  %v338_v4 = vld [vmem:[%s1872_s1] sm:$0xff]  ;;  %1308 = vmatprep.subr.mxu0 %v1569_v6  ;;  %vm1570_vm1 = vmmov 0   ;;  %s1571_s22 = smov 96  }
  0x35   : > { %1288 = vmatpush3.msra.mxu1 %v341_v0  ;;  %1310 = vmatprep.mubr.msk.f32.mxu0 %vm1570_vm1, %v1569_v6  ;;  %v1229_v8 = vld [vmem:[%s1873_s2] ss:$0 sm:$0xff]  ;;  %vm585_vm2 = vcmask 64512   ;;  %s1572_s17 = smov 64   ;;  %v763_v31 = vld [vmem:[%s1874_s3 + $0x18] sm:$0xff]  ;;  %v762_v37 = vld [vmem:[%s1874_s3 + $0x10] sm:$0xff] }
  0x36   : > { %s1894_s19 = smov (!%p329_p11, %s1227_s19), 3  ;;  %1289 = vmatprep.subr.mxu1 %v340_v1  ;;  %v761_v40 = vld [vmem:[%s1874_s3 + $0x8] sm:$0xff]  ;;  %v760_v41 = vld [vmem:[%s1874_s3] sm:$0xff]  ;;  %v1765_v47 = vshrl.u32 %v764_v46, 7  ;;  %vm996_vm3 = vcmask 523264   ;;  %s1250_s25 = sshll.u32 %s1642_s9, 8 }
  0x37   : > { %s1228_s20 = sshll.u32 %s1894_s19, 3  ;;  %1290 = vmatpush3.msra.mxu1 %v340_v1  ;;  %v1771_v49 = vld [vmem:[%s1878_s7] sm:$0x3f]  ;;  %s1826_s18 = scalar_lea.hbm %s1879_s8, %s1250_s25 }
  0x38   : > { %s332_s23 = scalar_lea.vmem %s1871_s0, %s1228_s20  ;;  %1291 = vmatprep.subr.mxu1 %v339_v3  ;;  %v766_v48 = vsub.s32 0, %v1765_v47  ;;  %s1573_s19 = smov [#allocation7]  }
  0x39   : > { %v1720_v2 = vld [vmem:[%s332_s23] sm:$0xff]  ;;  %1292 = vmatpush3.msra.mxu1 %v339_v3  ;;  %v1730_v5 = vld [vmem:[%s332_s23 + $0x8] sm:$0xff]  ;;  %s325_s23 = sand.u32 1, %s1555_s28   ;;  %s1499_s20 = sshll.u32 %s1573_s19, 4  ;;  %s1500_s20 = int_to_ptr.vmem [resolvable:$false] %s1499_s20 }
  0x3a   : > { %1295 = vmatprep.mubr.msk.f32.mxu1 %vm349_vm0, %v1720_v2  ;;  %1293 = vmatprep.subr.mxu1 %v338_v4  ;;  %v767_v50 = vrot.slane %v1771_v49, %v766_v48  ;;  %s1226_s24 = sshll.u32 %s325_s23, 4  ;;  %s1831_s21 = scalar_lea.sflag [#allocation4], %s325_s23 }
  0x3b   : > { %1294 = vmatpush3.msra.mxu1 %v338_v4  ;;  %s327_s26 = scalar_lea.vmem [#allocation7], %s1226_s24 }
  0x3c   : > { %1296 = vmatmul.mubr.msk.f32.vlgmr.msra.gmra.mxu1 %vm349_vm0, %v1730_v5  ;;  %1298 = vmatprep.subr.mxu1 %v1569_v6  ;;  %s1134_s10 = sshll.u32 %s327_s26, 4  ;;  %s1828_s10 = int_to_ptr.vmem [resolvable:$true] %s1134_s10 }
  0x3d   : > { %1300 = vmatprep.mubr.msk.f32.mxu1 %vm1570_vm1, %v1569_v6  ;;  %s1495_s9 = scalar_lea.vmem %s1828_s10, 256  ;;  %p1502_p1 = scmp.lt.s32.totalorder %s1828_s10, %s1500_s20 }
  0x3e   : > { %p1496_p10 = scmp.ne.s32.totalorder %s1828_s10, %s1495_s9 }
  0x40   : > { %p1497_p12 = pnand %p1496_p10, %p1659_p5 }
  0x42   : > { %p1498_p0 = pneg %p1497_p12 }
  0xfc   : > { %v1297_v7 = vpop.f32.mrf.mxu1 }
  0xfd   : > { %v428_v11 = vadd.f32 %v1297_v7, %v1229_v8  ;;  %v891_v7 = vld [vmem:[#allocation2 + $0x8] sm:$0xff] }
  0xfe   : > { %v422_v9 = vpop.f32.mrf.mxu1 }
  0xff   : > { %v423_v10 = vadd.f32 %v1229_v8, %v422_v9  ;;  %v890_v8 = vld [vmem:[#allocation2] sm:$0xff]  ;;  %v991_v9 = vld [vmem:[%s1877_s6 + $0x38] sm:$0xff] }
 0x101   : > { %432 = vrot.lane.b32.xlu0 %v423_v10, %s1571_s22 }
 0x105   : > { %509 = vrot.lane.b32.xlu0 %v428_v11, %s1571_s22  ;;  %s1501_s22 = scalar_lea.vmem %s1500_s20, 512 }
 0x106   : > { %p1503_p3 = scmp.lt.s32.totalorder %s1501_s22, %s1495_s9 }
 0x108   : > { %p1504_p2 = por %p1503_p3, %p1502_p1 }
 0x10a   : > { %p1505_p4 = pnand %p1504_p2, %p1498_p0 }
 0x173   : > { %v433_v12 = vpop.permute.xlu0 %432 }
 0x174   : > { %1299 = vmatpush3.xpose.msk.msra.mxu1 %vm349_vm0, %v433_v12  ;;  %v988_v12 = vld [vmem:[%s1877_s6 + $0x20] sm:$0xff] }
 0x175   : > { %1303 = vmatprep.subr.mxu1 %v1569_v6 }
 0x177   : > { %1301 = vmatmul.mubr.msk.f32.vlgmr.msra.gmra.mxu1 %vm349_vm0, %v423_v10  ;;  %v510_v13 = vpop.permute.xlu0 %509 }
 0x178   : > { %1304 = vmatpush3.xpose.msk.msra.mxu1 %vm349_vm0, %v510_v13  ;;  %1305 = vmatprep.mubr.msk.f32.mxu1 %vm1570_vm1, %v1569_v6 }
 0x179   : > { %1313 = vmatprep.subr.mxu1 %v1569_v6 }
 0x17b   : > { %1306 = vmatmul.mubr.msk.f32.vlgmr.msra.gmra.mxu1 %vm349_vm0, %v428_v11 }
 0x17c   : > { %1315 = vmatprep.mubr.msk.f32.mxu1 %vm1570_vm1, %v1569_v6  ;;  %v893_v6 = vld [vmem:[#allocation2 + $0x18] sm:$0xff] }
 0x237   : > { %v504_v14 = vpop.f32.mrf.mxu1 }
 0x238   : > { %v586_v15 = vsel %vm585_vm2, %v504_v14, -inf }
 0x239   : > { %587 = vmax.xlane.f32.xlu1 %v586_v15  ;;  %v1302_v16 = vpop.f32.mrf.mxu1 }
 0x23b   : > { %v581_v17 = vpop.f32.mrf.mxu1 }
 0x23c   : > { %v589_v18 = vsel %vm585_vm2, %v581_v17, -inf }
 0x23d   : > { %590 = vmax.xlane.f32.xlu1 %v589_v18  ;;  %v1307_v19 = vpop.f32.mrf.mxu1 }
 0x23e   : > { %v880_v19 = vsub.s32 1, %v1765_v47 }
 0x24e   : > { %608 = vrot.lane.b32.xlu1 %v423_v10, %s1572_s17  ;;  %v990_v10 = vld [vmem:[%s1877_s6 + $0x30] sm:$0xff] }
 0x2c2   : > { %v588_v20 = vpop.xlane.xlu1 %587 }
 0x2c3   : > { %v592_v21 = vsub.f32 %v504_v14, %v588_v20  ;;  %v886_v20 = vsub.s32 2, %v1765_v47 }
 0x2c5   : > { %v594_v22 = vmul.f32 1.442695, %v592_v21  ;;  %v881_v21 = vrot.slane %v1771_v49, %v880_v19 }
 0x2c6   : > { %v591_v23 = vpop.xlane.xlu1 %590 }
 0x2c7   : > { %1427 = vpow2.f32 %v594_v22  ;;  %v593_v24 = vsub.f32 %v581_v17, %v591_v23 }
 0x2c9   : > { %v596_v25 = vmul.f32 1.442695, %v593_v24  ;;  %v887_v24 = vrot.slane %v1771_v49, %v886_v20 }
 0x2ca   : > { %v609_v26 = vpop.permute.xlu1 %608 }
 0x2cb   : > { %1429 = vpow2.f32 %v596_v25  ;;  %1309 = vmatpush3.msra.mxu0 %v609_v26 }
 0x2cc   : > { %1318 = vmatprep.subr.mxu0 %v763_v31 }
 0x2d4   : > { %v1428_v27 = vpop.eup %1427 }
 0x2d5   : > { %v598_v28 = vsel %vm585_vm2, %v1428_v27, 0.0 }
 0x2d6   : > { %599 = vadd.xlane.f32.xlu0 %v598_v28 }
 0x2d8   : > { %v1430_v29 = vpop.eup %1429 }
 0x2d9   : > { %v601_v30 = vsel %vm585_vm2, %v1430_v29, 0.0 }
 0x2da   : > { %602 = vadd.xlane.f32.xlu1 %v601_v30 }
 0x2eb   : > { %684 = vrot.lane.b32.xlu1 %v428_v11, %s1572_s17  ;;  %v989_v11 = vld [vmem:[%s1877_s6 + $0x28] sm:$0xff] }
 0x35f   : > { %v600_v32 = vpop.xlane.xlu0 %599 }
 0x360   : > { %1431 = vrcp.f32 %v600_v32  ;;  %v986_v32 = vld [vmem:[%s1877_s6 + $0x10] sm:$0xff] }
 0x363   : > { %v603_v33 = vpop.xlane.xlu1 %602 }
 0x364   : > { %1433 = vrcp.f32 %v603_v33  ;;  %v985_v33 = vld [vmem:[%s1877_s6 + $0x8] sm:$0xff] }
 0x367   : > { %v685_v34 = vpop.permute.xlu1 %684 }
 0x368   : > { %1314 = vmatpush3.msra.mxu1 %v685_v34  ;;  %v984_v34 = vld [vmem:[%s1877_s6] sm:$0xff] }
 0x369   : > { %1329 = vmatprep.subr.mxu1 %v893_v6 }
 0x36d   : > { %v1432_v35 = vpop.eup %1431 }
 0x36e   : > { %v606_v36 = vmul.f32 %v1432_v35, %v1428_v27  ;;  %v1240_v35 = vld [vmem:[#allocation5] ss:$0 sm:$0xff] }
 0x370   : > { %1311 = vmatmul.mubr.msk.f32.vlgmr.msra.gmra.mxu0 %vm585_vm2, %v606_v36 }
 0x371   : > { %v1434_v38 = vpop.eup %1433  ;;  %1319 = vmatpush3.msra.mxu0 %v763_v31  ;;  %v987_v31 = vld [vmem:[%s1877_s6 + $0x18] sm:$0xff] }
 0x372   : > { %v607_v39 = vmul.f32 %v1434_v38, %v1430_v29  ;;  %1320 = vmatprep.subr.mxu0 %v762_v37 }
 0x373   : > { %1321 = vmatpush3.msra.mxu0 %v762_v37 }
 0x374   : > { %1316 = vmatmul.mubr.msk.f32.vlgmr.msra.gmra.mxu1 %vm585_vm2, %v607_v39  ;;  %1322 = vmatprep.subr.mxu0 %v761_v40 }
 0x375   : > { %1323 = vmatpush3.msra.mxu0 %v761_v40  ;;  %1330 = vmatpush3.msra.mxu1 %v893_v6 }
 0x376   : > { %1324 = vmatprep.subr.mxu0 %v760_v41 }
 0x377   : > { %1325 = vmatpush3.msra.mxu0 %v760_v41 }
 0x378   : > { %1340 = vmatprep.subr.mxu0 %v991_v9 }
 0x430   : > { %v680_v42 = vpop.f32.mrf.mxu0 }
 0x431   : > { %1326 = vmatprep.mubr.msk.f32.mxu0 %vm349_vm0, %v680_v42  ;;  %v994_v42 = vsub.s32 3, %v1765_v47 }
 0x432   : > { %v1312_v43 = vpop.f32.mrf.mxu0 }
 0x433   : > { %v995_v43 = vrot.slane %v1771_v49, %v994_v42 }
 0x434   : > { %v756_v44 = vpop.f32.mrf.mxu1 }
 0x435   : > { %1327 = vmatmul.mubr.msk.f32.vlgmr.msra.gmra.mxu0 %vm349_vm0, %v756_v44 }
 0x436   : > { %v1317_v45 = vpop.f32.mrf.mxu1  ;;  %1341 = vmatpush3.msra.mxu0 %v991_v9 }
 0x437   : > { %1342 = vmatprep.subr.mxu0 %v990_v10 }
 0x438   : > { %1343 = vmatpush3.msra.mxu0 %v990_v10 }
 0x439   : > { %1344 = vmatprep.subr.mxu0 %v989_v11 }
 0x43a   : > { %1345 = vmatpush3.msra.mxu0 %v989_v11 }
 0x43b   : > { %1346 = vmatprep.subr.mxu0 %v988_v12 }
 0x43c   : > { %1347 = vmatpush3.msra.mxu0 %v988_v12 }
 0x43d   : > { %1348 = vmatprep.subr.mxu0 %v987_v31 }
 0x43e   : > { %1349 = vmatpush3.msra.mxu0 %v987_v31 }
 0x43f   : > { %1350 = vmatprep.subr.mxu0 %v986_v32 }
 0x440   : > { %1351 = vmatpush3.msra.mxu0 %v986_v32 }
 0x441   : > { %1352 = vmatprep.subr.mxu0 %v985_v33 }
 0x442   : > { %1353 = vmatpush3.msra.mxu0 %v985_v33 }
 0x443   : > { %1354 = vmatprep.subr.mxu0 %v984_v34 }
 0x444   : > { %1355 = vmatpush3.msra.mxu0 %v984_v34 }
 0x4f5   : > { %v1328_v51 = vpop.f32.mrf.mxu0 }
 0x4f6   : > { %v846_v52 = vadd.f32 %v1328_v51, %v767_v50 }
 0x4f7   : > { %v840_v53 = vpop.f32.mrf.mxu0 }
 0x4f8   : > { %v841_v54 = vadd.f32 %v840_v53, %v767_v50  ;;  %v850_v55 = vadd.f32 %v846_v52, %v1730_v5 }
 0x4fa   : > { %v854_v56 = vsel %vm349_vm0, %v850_v55, 0.0  ;;  %v849_v57 = vadd.f32 %v841_v54, %v1720_v2  ;;  %v892_v2 = vld [vmem:[#allocation2 + $0x10] sm:$0xff] }
 0x4fb   : > { %855 = vadd.xlane.f32.xlu0 %v854_v56  ;;  %1331 = vmatprep.subr.mxu1 %v892_v2 }
 0x4fc   : > { %v851_v58 = vsel %vm349_vm0, %v849_v57, 0.0  ;;  %1332 = vmatpush3.msra.mxu1 %v892_v2  ;;  %v1108_v2 = vsub.s32 4, %v1765_v47 }
 0x4fd   : > { %852 = vadd.xlane.f32.xlu1 %v851_v58  ;;  %1333 = vmatprep.subr.mxu1 %v891_v7 }
 0x4fe   : > { %1334 = vmatpush3.msra.mxu1 %v891_v7  ;;  %v1114_v7 = vsub.s32 5, %v1765_v47 }
 0x4ff   : > { %1335 = vmatprep.subr.mxu1 %v890_v8 }
 0x500   : > { %1336 = vmatpush3.msra.mxu1 %v890_v8  ;;  %v1109_v8 = vrot.slane %v1771_v49, %v1108_v2  ;;  %v1115_v10 = vrot.slane %v1771_v49, %v1114_v7 }
 0x584   : > { %v856_v59 = vpop.xlane.xlu0 %855 }
 0x585   : > { %v859_v60 = vmul.f32 0.03125, %v856_v59 }
 0x586   : > { %v853_v61 = vpop.xlane.xlu1 %852 }
 0x587   : > { %v858_v62 = vmul.f32 0.03125, %v853_v61  ;;  %v861_v63 = vsub.f32 %v850_v55, %v859_v60 }
 0x589   : > { %v860_v0 = vsub.f32 %v849_v57, %v858_v62  ;;  %v863_v4 = vmul.f32 %v861_v63, %v861_v63 }
 0x58b   : > { %v862_v1 = vmul.f32 %v860_v0, %v860_v0  ;;  %v867_v5 = vsel %vm349_vm0, %v863_v4, 0.0 }
 0x58d   : > { %v864_v3 = vsel %vm349_vm0, %v862_v1, 0.0 }
 0x58e   : > { %865 = vadd.xlane.f32.xlu0 %v864_v3 }
 0x592   : > { %868 = vadd.xlane.f32.xlu0 %v867_v5 }
 0x617   : > { %v866_v13 = vpop.xlane.xlu0 %865 }
 0x618   : > { %v870_v14 = vmul.f32 0.03125, %v866_v13 }
 0x61a   : > { %v872_v15 = vadd.f32 1e-05, %v870_v14 }
 0x61b   : > { %v869_v16 = vpop.xlane.xlu0 %868 }
 0x61c   : > { %1435 = vrsqrt.f32 %v872_v15  ;;  %v871_v17 = vmul.f32 0.03125, %v869_v16 }
 0x61e   : > { %v873_v18 = vadd.f32 1e-05, %v871_v17 }
 0x620   : > { %1437 = vrsqrt.f32 %v873_v18 }
 0x629   : > { %v1436_v22 = vpop.eup %1435 }
 0x62a   : > { %v876_v23 = vmul.f32 %v1436_v22, %v860_v0 }
 0x62c   : > { %v882_v25 = vmul.f32 %v881_v21, %v876_v23 }
 0x62d   : > { %v1438_v26 = vpop.eup %1437 }
 0x62e   : > { %v877_v27 = vmul.f32 %v1438_v26, %v861_v63  ;;  %v888_v28 = vadd.f32 %v887_v24, %v882_v25 }
 0x630   : > { %v883_v29 = vmul.f32 %v881_v21, %v877_v27  ;;  %1337 = vmatprep.mubr.msk.f32.mxu1 %vm349_vm0, %v888_v28 }
 0x632   : > { %v889_v30 = vadd.f32 %v887_v24, %v883_v29 }
 0x634   : > { %1338 = vmatmul.mubr.msk.f32.vlgmr.msra.gmra.mxu1 %vm349_vm0, %v889_v30 }
 0x6f4   : > { %v1339_v36 = vpop.f32.mrf.mxu1 }
 0x6f5   : > { %v979_v37 = vadd.f32 %v1339_v36, %v1240_v35 }
 0x6f6   : > { %v973_v38 = vpop.f32.mrf.mxu1 }
 0x6f7   : > { %v974_v39 = vadd.f32 %v1240_v35, %v973_v38  ;;  %v983_v41 = vmax.f32 %v979_v37, 0.0 }
 0x6f9   : > { %v982_v40 = vmax.f32 %v974_v39, 0.0 }
 0x6fb   : > { %1356 = vmatprep.mubr.msk.f32.mxu0 %vm996_vm3, %v982_v40 }
 0x6fc   : > { %1357 = vmatmul.mubr.msk.f32.vlgmr.msra.gmra.mxu0 %vm996_vm3, %v983_v41 }
 0x7bc   : > { %v1358_v44 = vpop.f32.mrf.mxu0 }
 0x7bd   : > { %v1075_v46 = vadd.f32 %v1358_v44, %v995_v43 }
 0x7be   : > { %v1069_v45 = vpop.f32.mrf.mxu0 }
 0x7bf   : > { %v1070_v48 = vadd.f32 %v1069_v45, %v995_v43  ;;  %v1079_v52 = vadd.f32 %v1075_v46, %v889_v30 }
 0x7c1   : > { %v1078_v50 = vadd.f32 %v1070_v48, %v888_v28  ;;  %v1083_v53 = vsel %vm349_vm0, %v1079_v52, 0.0 }
 0x7c3   : > { %v1080_v51 = vsel %vm349_vm0, %v1078_v50, 0.0 }
 0x7c4   : > { %1081 = vadd.xlane.f32.xlu0 %v1080_v51 }
 0x7c8   : > { %1084 = vadd.xlane.f32.xlu0 %v1083_v53 }
 0x84d   : > { %v1082_v54 = vpop.xlane.xlu0 %1081 }
 0x84e   : > { %v1086_v55 = vmul.f32 0.03125, %v1082_v54 }
 0x850   : > { %v1088_v56 = vsub.f32 %v1078_v50, %v1086_v55 }
 0x851   : > { %v1085_v57 = vpop.xlane.xlu0 %1084 }
 0x852   : > { %v1087_v58 = vmul.f32 0.03125, %v1085_v57  ;;  %v1090_v59 = vmul.f32 %v1088_v56, %v1088_v56 }
 0x854   : > { %v1089_v60 = vsub.f32 %v1079_v52, %v1087_v58  ;;  %v1092_v61 = vsel %vm349_vm0, %v1090_v59, 0.0 }
 0x855   : > { %1093 = vadd.xlane.f32.xlu0 %v1092_v61 }
 0x856   : > { %v1091_v62 = vmul.f32 %v1089_v60, %v1089_v60 }
 0x858   : > { %v1095_v63 = vsel %vm349_vm0, %v1091_v62, 0.0 }
 0x859   : > { %1096 = vadd.xlane.f32.xlu0 %v1095_v63 }
 0x8de   : > { %v1094_v0 = vpop.xlane.xlu0 %1093 }
 0x8df   : > { %v1098_v1 = vmul.f32 0.03125, %v1094_v0 }
 0x8e1   : > { %v1100_v3 = vadd.f32 1e-05, %v1098_v1 }
 0x8e2   : > { %v1097_v4 = vpop.xlane.xlu0 %1096 }
 0x8e3   : > { %1439 = vrsqrt.f32 %v1100_v3  ;;  %v1099_v5 = vmul.f32 0.03125, %v1097_v4 }
 0x8e5   : > { %v1101_v6 = vadd.f32 1e-05, %v1099_v5 }
 0x8e7   : > { %1441 = vrsqrt.f32 %v1101_v6 }
 0x8f0   : > { %v1440_v9 = vpop.eup %1439 }
 0x8f1   : > { %v1104_v11 = vmul.f32 %v1440_v9, %v1088_v56 }
 0x8f3   : > { %v1110_v12 = vmul.f32 %v1109_v8, %v1104_v11 }
 0x8f4   : > { %v1442_v13 = vpop.eup %1441 }
 0x8f5   : > { %v1116_v14 = vadd.f32 %v1115_v10, %v1110_v12  ;;  %v1105_v15 = vmul.f32 %v1442_v13, %v1089_v60 }
 0x8f7   : > { %v1111_v16 = vmul.f32 %v1109_v8, %v1105_v15  ;;  %1118 = vst.msk [vmem:[%s327_s26] sm:$0xff] %vm349_vm0, %v1116_v14 }
 0x8f9   : > { %v1117_v47 = vadd.f32 %v1115_v10, %v1111_v16 }
 0x8fb   : > { %1119 = vst.msk [vmem:[%s327_s26 + $0x8] sm:$0xff] %vm349_vm0, %v1117_v47 }
 0x8fc   : > { %1508 = shalt.err (!%p1505_p4)
}
 0x8fd   : > { %s1509_s17 = scalar_lea.hbm %s1826_s18, 256  ;;  %s1513_s25 = scalar_lea.hbm %s1879_s8, 512 }
 0x8fe   : > { %p1510_p7 = scmp.ne.s32.totalorder %s1826_s18, %s1509_s17  ;;  %p1514_p9 = scmp.lt.s32.totalorder %s1826_s18, %s1879_s8 }
 0x8ff   : > { %p1515_p11 = scmp.lt.s32.totalorder %s1513_s25, %s1509_s17 }
 0x900   : > { %p1511_p13 = pnand %p1510_p7, %p1659_p5 }
 0x901   : > { %p1516_p10 = por %p1515_p11, %p1514_p9 }
 0x902   : > { %p1512_p8 = pneg %p1511_p13 }
 0x904   : > { %p1517_p12 = pnand %p1516_p10, %p1512_p8 }
 0x906   : > { %1520 = shalt.err (!%p1517_p12)
}
 0x907   : > { %s1574_s13 = smov 128   ;;  %s1575_s9 = smov 8  }
 0x908   : > { %1367 = dma.vmem_to_hbm [thread:$0]  (%p1659_p5), %s1828_s10, 256, %s1826_s18, %s1831_s21, %s1574_s13, %s1574_s13, %s1575_s9  }
 0x909 PF: > { %p1384_p0 = scmp.ge.s32.totalorder %s1563_s30, 2  ;;  %s1149_s19 = sand.u32 1, %s1551_s27  }
 0x90a   : > { %s1150_s20 = scalar_lea.sflag [#allocation4], %s1149_s19 }
 0x90b   : > { %p1377_p1 = pnand %p1384_p0, %p1663_p6 }
 0x90d   : > { %p1378_p3 = pneg %p1377_p1 }
 0x90f   : > { %1546 = dma.done.wait (%p1378_p3), %s1150_s20, 256  }
 0x910   : > { %1548 = vsyncadd (%p1378_p3), %s1150_s20, 4294967040  ;;  %p20_p2 = scmp.ge.s32.totalorder %s1646_s11, 4   ;;  %s1889_s27 = smov %s1555_s28 }
 0x911   : > { %s1890_s28 = smov %s1559_s29  ;;  %s1891_s29 = smov %s1657_s14 }
 0x912   : > { %s1892_s30 = smov %s1646_s11  ;;  %22 = sbr.rel (!%p20_p2) target bundleno = 5 (0x5), region = 96 }
 0x917   :  { %1155 = vsyncpa [#allocation3], 1 }
 0x918   :  { %1157 = vsyncpa [#allocation3 + $0x1], 1 }
 0x919   :  { %1158 = vsyncpa [#allocation6], 1 }
 0x91a   :  { %1159 = vsyncpa [#allocation4], 1 }
 0x91b   :  { %1161 = vsyncpa [#allocation4 + $0x1], 1 }

</bundles_post_ra>
